<compile_context>
chip_gen: v6e
topology: v6e:2x2x1
jax: 0.10.0
libtpu: 0.0.40
codegen_flags: <defaults>
</compile_context>

<pallas_src>
import functools

import jax
import jax.numpy as jnp
from jax.experimental import pallas as pl
from jax.experimental.pallas import tpu as pltpu

MARGIN = 2.0
_PAIRWISE_EPS = 1e-6  # torch.nn.functional.pairwise_distance default eps


def _round_up(x, m):
    return ((x + m - 1) // m) * m


def _round_down(x, m):
    return (x // m) * m


def _contrastive_loss_kernel(x0_ref, x1_ref, y_ref, out_ref, acc_ref, *,
                             batch, block_rows, margin):
    i = pl.program_id(0)

    @pl.when(i == 0)
    def _init():
        acc_ref[...] = jnp.zeros_like(acc_ref)

    # Native-dtype blocks are DMA'd; cast to f32 in-register.
    x0 = x0_ref[...].astype(jnp.float32)          # (TB, D)
    x1 = x1_ref[...].astype(jnp.float32)          # (TB, D)
    y = y_ref[...].astype(jnp.float32)            # (TB, 1)

    # Euclidean pairwise distance per row (torch adds eps to the difference).
    diff = x0 - x1 + _PAIRWISE_EPS
    dist_sq = jnp.sum(diff * diff, axis=1, keepdims=True)    # (TB, 1)
    dist = jnp.sqrt(dist_sq)                                  # (TB, 1)

    hinge = jnp.maximum(margin - dist, 0.0)
    per_example = (1.0 - y) * dist_sq + y * (hinge * hinge)   # (TB, 1)

    # Mask padded tail rows (last tile when B % TB != 0). jnp.where is a select,
    # so any garbage in the padded region cannot leak into the sum.
    row = i * block_rows + jax.lax.broadcasted_iota(jnp.int32, per_example.shape, 0)
    per_example = jnp.where(row < batch, per_example, 0.0)

    acc_ref[...] += jnp.sum(per_example, axis=0, keepdims=True)   # (1, 1)

    # Output block is resident (constant index_map); write the scaled running sum every
    # step so the final HBM writeback always holds the mean over all B rows.
    out_ref[...] = acc_ref[...] * (1.0 / batch)


def contrastive_loss(x0, x1, y, *, margin=MARGIN, block_rows=None):
    """x0, x1: (B, D) arrays (any float dtype); y: (B,) or (B, 1). Returns scalar f32 loss."""
    B, D = x0.shape
    y2d = jnp.reshape(y, (B, 1)).astype(jnp.float32)

    # Pick a batch tile: keep each input block <= ~2 MiB so that
    # 2 inputs x 2 pipeline buffers stay well inside every generation's scoped VMEM.
    if block_rows is None:
        bytes_per_row = D * jnp.dtype(x0.dtype).itemsize
        target_block_bytes = 2 * 1024 * 1024
        block_rows = max(8, _round_down(target_block_bytes // max(bytes_per_row, 1), 8))
    block_rows = min(block_rows, _round_up(B, 8))
    block_rows = max(8, _round_up(block_rows, 8))
    num_tiles = pl.cdiv(B, block_rows)

    kernel = functools.partial(
        _contrastive_loss_kernel, batch=B, block_rows=block_rows, margin=margin)

    out = pl.pallas_call(
        kernel,
        out_shape=jax.ShapeDtypeStruct((1, 1), jnp.float32),
        grid=(num_tiles,),
        in_specs=[
            pl.BlockSpec((block_rows, D), lambda i: (i, 0)),
            pl.BlockSpec((block_rows, D), lambda i: (i, 0)),
            pl.BlockSpec((block_rows, 1), lambda i: (i, 0)),
        ],
        out_specs=pl.BlockSpec((1, 1), lambda i: (0, 0)),
        scratch_shapes=[pltpu.VMEM((1, 1), jnp.float32)],
        compiler_params=pltpu.CompilerParams(
            dimension_semantics=("arbitrary",),      # reduction axis into resident accumulator
            vmem_limit_bytes=32 * 1024 * 1024,
        ),
    )(x0, x1, y2d)
    return out[0, 0]


def _reference(x0, x1, y):
    # Pure-JAX reference mirroring the torch forward.
    diff = x0.astype(jnp.float32) - x1.astype(jnp.float32) + _PAIRWISE_EPS
    d = jnp.sqrt(jnp.sum(diff * diff, axis=1))
    y = y.astype(jnp.float32)
    return jnp.mean((1.0 - y) * d * d + y * jnp.square(jnp.maximum(MARGIN - d, 0.0)))


if __name__ == "__main__":
    key = jax.random.PRNGKey(0)
    k0, k1, k2 = jax.random.split(key, 3)

    # Small siamese-head embedding pairs.
    B, D = 8, 32
    x0 = jax.random.normal(k0, (B, D), dtype=jnp.float32)
    x1 = jax.random.normal(k1, (B, D), dtype=jnp.float32)
    y = jax.random.bernoulli(k2, 0.5, (B,)).astype(jnp.float32)

    loss = contrastive_loss(x0, x1, y)
    jax.block_until_ready(loss)
    ref = _reference(x0, x1, y)
    assert jnp.allclose(loss, ref, rtol=1e-5, atol=1e-5), (loss, ref)

    # Exercise multi-tile grid + ragged-tail masking (B not a multiple of the tile).
    k3, k4, k5 = jax.random.split(jax.random.PRNGKey(0), 3)
    B2, D2 = 20, 64
    x0b = jax.random.normal(k3, (B2, D2), dtype=jnp.float32)
    x1b = jax.random.normal(k4, (B2, D2), dtype=jnp.float32)
    yb = jax.random.bernoulli(k5, 0.5, (B2,)).astype(jnp.float32)
    loss2 = contrastive_loss(x0b, x1b, yb, block_rows=8)
    jax.block_until_ready(loss2)
    ref2 = _reference(x0b, x1b, yb)
    assert jnp.allclose(loss2, ref2, rtol=1e-5, atol=1e-5), (loss2, ref2)

    print("KERNEL_OK")
</pallas_src>

<mosaic_0001>
module attributes {stable_mosaic.version = 11 : i64} {
  func.func @_contrastive_loss_kernel(%arg0: i32, %arg1: memref<8x32xf32, #tpu.memory_space<vmem>>, %arg2: memref<8x32xf32, #tpu.memory_space<vmem>>, %arg3: memref<8x1xf32, #tpu.memory_space<vmem>>, %arg4: memref<1x1xf32, #tpu.memory_space<vmem>>, %arg5: memref<1x1xf32, #tpu.memory_space<vmem>>) attributes {dimension_semantics = [#tpu.dimension_semantics<arbitrary>], iteration_bounds = array<i64: 1>, scalar_prefetch = 0 : i64, scratch_operands = 1 : i64, tpu.core_type = #tpu.core_type<tc>, window_params = [{transform_indices = @transform_0, window_bounds = array<i64: 8, 32>}, {transform_indices = @transform_1, window_bounds = array<i64: 8, 32>}, {transform_indices = @transform_2, window_bounds = array<i64: 8, 1>}, {pipeline_mode = #tpu.pipeline_mode<synchronous>, transform_indices = @transform_3, window_bounds = array<i64: 1, 1>}]} {
    %c0_i32 = arith.constant 0 : i32
    %0 = arith.cmpi eq, %arg0, %c0_i32 : i32
    %1 = arith.extui %0 : i1 to i32
    %c0_i32_0 = arith.constant 0 : i32
    %2 = arith.cmpi ne, %1, %c0_i32_0 : i32
    scf.if %2 {
      %cst_22 = arith.constant 0.000000e+00 : f32
      %40 = vector.broadcast %cst_22 : f32 to vector<1x1xf32>
      %c0_23 = arith.constant 0 : index
      %c0_24 = arith.constant 0 : index
      %41 = vector.load %arg5[%c0_23, %c0_24] : memref<1x1xf32, #tpu.memory_space<vmem>>, vector<1x1xf32>
      tpu.vector_store %arg5[%c0_23, %c0_24], %40 {strides = array<i32>} : memref<1x1xf32, #tpu.memory_space<vmem>>, vector<1x1xf32>,
    } else {
    }
    %c0 = arith.constant 0 : index
    %c0_1 = arith.constant 0 : index
    %3 = vector.load %arg1[%c0, %c0_1] : memref<8x32xf32, #tpu.memory_space<vmem>>, vector<8x32xf32>
    %c0_2 = arith.constant 0 : index
    %c0_3 = arith.constant 0 : index
    %4 = vector.load %arg2[%c0_2, %c0_3] : memref<8x32xf32, #tpu.memory_space<vmem>>, vector<8x32xf32>
    %c0_4 = arith.constant 0 : index
    %c0_5 = arith.constant 0 : index
    %5 = vector.load %arg3[%c0_4, %c0_5] : memref<8x1xf32, #tpu.memory_space<vmem>>, vector<8x1xf32>
    %6 = arith.subf %3, %4 : vector<8x32xf32>
    %cst = arith.constant 9.99999997E-7 : f32
    %7 = vector.broadcast %cst : f32 to vector<8x32xf32>
    %8 = arith.addf %6, %7 : vector<8x32xf32>
    %9 = arith.mulf %8, %8 : vector<8x32xf32>
    %cst_6 = arith.constant dense<0.000000e+00> : vector<8xf32>
    %10 = vector.multi_reduction <add>, %9, %cst_6 [1] : vector<8x32xf32> to vector<8xf32>
    %11 = vector.shape_cast %10 : vector<8xf32> to vector<8x1xf32>
    %12 = math.sqrt %11 : vector<8x1xf32>
    %cst_7 = arith.constant 2.000000e+00 : f32
    %13 = vector.broadcast %cst_7 : f32 to vector<8x1xf32>
    %14 = arith.subf %13, %12 : vector<8x1xf32>
    %cst_8 = arith.constant 0.000000e+00 : f32
    %15 = vector.broadcast %cst_8 : f32 to vector<8x1xf32>
    %16 = arith.maximumf %14, %15 : vector<8x1xf32>
    %cst_9 = arith.constant 1.000000e+00 : f32
    %17 = vector.broadcast %cst_9 : f32 to vector<8x1xf32>
    %18 = arith.subf %17, %5 : vector<8x1xf32>
    %19 = arith.mulf %18, %11 : vector<8x1xf32>
    %20 = arith.mulf %16, %16 : vector<8x1xf32>
    %21 = arith.mulf %5, %20 : vector<8x1xf32>
    %22 = arith.addf %19, %21 : vector<8x1xf32>
    %c8_i32 = arith.constant 8 : i32
    %23 = arith.muli %arg0, %c8_i32 : i32
    %24 = tpu.iota {dimensions = array<i32: 0>} : vector<8x1xi32>
    %25 = vector.broadcast %23 : i32 to vector<8x1xi32>
    %26 = arith.addi %25, %24 : vector<8x1xi32>
    %c8_i32_10 = arith.constant 8 : i32
    %27 = vector.broadcast %c8_i32_10 : i32 to vector<8x1xi32>
    %28 = arith.cmpi slt, %26, %27 : vector<8x1xi32>
    %cst_11 = arith.constant 0.000000e+00 : f32
    %29 = vector.broadcast %cst_11 : f32 to vector<8x1xf32>
    %30 = arith.select %28, %22, %29 : vector<8x1xi1>, vector<8x1xf32>
    %c0_12 = arith.constant 0 : index
    %c0_13 = arith.constant 0 : index
    %31 = vector.load %arg5[%c0_12, %c0_13] : memref<1x1xf32, #tpu.memory_space<vmem>>, vector<1x1xf32>
    %cst_14 = arith.constant dense<0.000000e+00> : vector<1xf32>
    %32 = vector.multi_reduction <add>, %30, %cst_14 [0] : vector<8x1xf32> to vector<1xf32>
    %33 = vector.shape_cast %32 : vector<1xf32> to vector<1x1xf32>
    %34 = arith.addf %31, %33 : vector<1x1xf32>
    %c0_15 = arith.constant 0 : index
    %c0_16 = arith.constant 0 : index
    %35 = vector.load %arg5[%c0_15, %c0_16] : memref<1x1xf32, #tpu.memory_space<vmem>>, vector<1x1xf32>
    tpu.vector_store %arg5[%c0_15, %c0_16], %34 {strides = array<i32>} : memref<1x1xf32, #tpu.memory_space<vmem>>, vector<1x1xf32>,
    %c0_17 = arith.constant 0 : index
    %c0_18 = arith.constant 0 : index
    %36 = vector.load %arg5[%c0_17, %c0_18] : memref<1x1xf32, #tpu.memory_space<vmem>>, vector<1x1xf32>
    %cst_19 = arith.constant 1.250000e-01 : f32
    %37 = vector.broadcast %cst_19 : f32 to vector<1x1xf32>
    %38 = arith.mulf %36, %37 : vector<1x1xf32>
    %c0_20 = arith.constant 0 : index
    %c0_21 = arith.constant 0 : index
    %39 = vector.load %arg4[%c0_20, %c0_21] : memref<1x1xf32, #tpu.memory_space<vmem>>, vector<1x1xf32>
    tpu.vector_store %arg4[%c0_20, %c0_21], %38 {strides = array<i32>} : memref<1x1xf32, #tpu.memory_space<vmem>>, vector<1x1xf32>,
    return
  }
  func.func @transform_0(%arg0: i32) -> (i32, i32) {
    %c0_i32 = arith.constant 0 : i32
    %c0_i32_0 = arith.constant 0 : i32
    return %arg0, %c0_i32 : i32, i32
  }
  func.func @transform_1(%arg0: i32) -> (i32, i32) {
    %c0_i32 = arith.constant 0 : i32
    %c0_i32_0 = arith.constant 0 : i32
    return %arg0, %c0_i32 : i32, i32
  }
  func.func @transform_2(%arg0: i32) -> (i32, i32) {
    %c0_i32 = arith.constant 0 : i32
    %c0_i32_0 = arith.constant 0 : i32
    return %arg0, %c0_i32 : i32, i32
  }
  func.func @transform_3(%arg0: i32) -> (i32, i32) {
    %c0_i32 = arith.constant 0 : i32
    %c0_i32_0 = arith.constant 0 : i32
    %c0_i32_1 = arith.constant 0 : i32
    return %c0_i32, %c0_i32_0 : i32, i32
  }
}

</mosaic_0001>

<bundles_post_ra>
// kernel: tpu_custom_call.1
= control target key start
LH: loop header
LB: loop body
LE: loop exit
PB: predicated region body
PF: predicated region fallthrough
CT: control target
= control target key end

     0   :  { %8 = vsyncpa [#allocation4], 0  ;;  %s181_s0 = inlined_call_operand.vmem [shape: f32[8,32], index: 0, kind: input, shape index: {}]   ;;  %s182_s1 = inlined_call_operand.hbm [shape: f32[8,32], index: 1, kind: input, shape index: {}]   ;;  %s183_s2 = inlined_call_operand.vmem [shape: f32[8,1], index: 2, kind: input, shape index: {}]   ;;  %s184_s3 = inlined_call_operand.hbm [shape: f32[1,1], index: 3, kind: output, shape index: {}]  }
   0x1   :  { %9 = vsyncpa [#allocation5], 0  ;;  %s143_s12 = smov [#allocation3]  }
   0x2   :  { %s18_s13 = sshll.u32 %s143_s12, 4  ;;  %s19_s13 = int_to_ptr.vmem [resolvable:$true] %s18_s13 }
   0x3   :  { %s107_s14 = scalar_lea.vmem %s19_s13, 128  ;;  %p112_p1 = scmp.lt.s32.totalorder %s19_s13, %s19_s13 }
   0x4   :  { %p108_p0 = scmp.ne.s32.totalorder %s19_s13, %s107_s14  ;;  %p113_p2 = scmp.lt.s32.totalorder %s107_s14, %s107_s14 }
   0x6   :  { %p114_p3 = por %p113_p2, %p112_p1 }
   0x8   :  { %p115_p4 = pnand %p114_p3, %p108_p0 }
   0xa   :  { %118 = shalt.err (!%p115_p4)
}
   0xb   :  { %21 = dma.hbm_to_vmem [thread:$0]  %s182_s1, 128, %s19_s13, [#allocation4]  }
   0xc   :  { %139 = dma.done.wait [#allocation4], 128  }
   0xd   :  { %140 = vsyncadd [#allocation4], 4294967168  ;;  %v33_v0 = vld [vmem:[%s181_s0] sm:$0xff]  ;;  %vm39_vm0 = vcmask 261120   ;;  %vm31_vm1 = vcmask 0   ;;  %v144_v6 = vmov 0.0  }
   0xe   :  { %v34_v1 = vld [vmem:[#allocation3] sm:$0xff]  ;;  %32 = vst.msk [vmem:[#allocation2] sm:$0x1] %vm31_vm1, %v144_v6  ;;  %vm65_vm4 = vcmask 7168  }
   0xf   :  { %v36_v2 = vsub.f32 %v33_v0, %v34_v1  ;;  %v35_v12 = vld [vmem:[%s183_s2] sm:$0xff]  ;;  %s145_s2 = smov [#allocation6]  }
  0x10   :  { %v52_v16 = vsub.f32 1.0, %v35_v12  ;;  %s85_s19 = sshll.u32 %s145_s2, 4  ;;  %s86_s19 = int_to_ptr.vmem [resolvable:$true] %s85_s19 }
  0x11   :  { %v37_v3 = vadd.f32 1e-06, %v36_v2  ;;  %s119_s20 = scalar_lea.vmem %s86_s19, 16  ;;  %s123_s21 = scalar_lea.vmem %s86_s19, 32 }
  0x12   :  { %p120_p5 = scmp.ne.s32.totalorder %s86_s19, %s119_s20  ;;  %p124_p6 = scmp.lt.s32.totalorder %s86_s19, %s86_s19 }
  0x13   :  { %v38_v4 = vmul.f32 %v37_v3, %v37_v3  ;;  %p125_p7 = scmp.lt.s32.totalorder %s123_s21, %s119_s20 }
  0x15   :  { %v40_v5 = vsel %vm39_vm0, %v38_v4, 0.0  ;;  %v64_v27 = vld [vmem:[#allocation2] sm:$0x1]  ;;  %p126_p8 = por %p125_p7, %p124_p6 }
  0x16   :  { %41 = vadd.xlane.f32.xlu0 %v40_v5 }
  0x17   :  { %p127_p9 = pnand %p126_p8, %p120_p5 }
  0x9f   :  { %v42_v7 = vpop.xlane.xlu0 %41 }
  0xa0   :  { %97 = vrsqrt.f32 %v42_v7  ;;  %vm45_vm2 = vcmp.eq.f32.partialorder %v42_v7, inf  ;;  %v48_v10 = vand.u32 2147483648, %v42_v7  ;;  %vm47_vm3 = vcmp.eq.f32.partialorder %v42_v7, 0.0 }
  0xa1   :  { %v53_v18 = vmul.f32 %v52_v16, %v42_v7 }
  0xad   :  { %v98_v8 = vpop.eup %97 }
  0xae   :  { %v44_v9 = vmul.f32 %v98_v8, %v42_v7 }
  0xb0   :  { %v46_v11 = vsel %vm45_vm2, %v42_v7, %v44_v9 }
  0xb1   :  { %v49_v13 = vsel %vm47_vm3, %v48_v10, %v46_v11 }
  0xb2   :  { %v50_v14 = vsub.f32 2.0, %v49_v13 }
  0xb4   :  { %v51_v15 = vmax.f32 %v50_v14, 0.0 }
  0xb6   :  { %v54_v17 = vmul.f32 %v51_v15, %v51_v15 }
  0xb8   :  { %v55_v19 = vmul.f32 %v54_v17, %v35_v12 }
  0xba   :  { %v56_v20 = vadd.f32 %v55_v19, %v53_v18 }
  0xbc   :  { %v66_v21 = vsel %vm65_vm4, %v56_v20, 0.0 }
  0xbd   :  { %v67_v22 = vrot.slane %v66_v21, 4 }
  0xbf   :  { %v68_v23 = vadd.f32 %v67_v22, %v66_v21 }
  0xc1   :  { %v69_v24 = vrot.slane %v68_v23, 2 }
  0xc3   :  { %v70_v25 = vadd.f32 %v69_v24, %v68_v23 }
  0xc5   :  { %v71_v26 = vrot.slane %v70_v25, 1 }
  0xc7   :  { %v72_v28 = vadd.f32 %v71_v26, %v70_v25 }
  0xc9   :  { %v73_v29 = vadd.f32 %v72_v28, %v64_v27 }
  0xcb   :  { %75 = vst.msk [vmem:[#allocation2] sm:$0x1] %vm31_vm1, %v73_v29 }
  0xd2   :  { %v76_v30 = vld [vmem:[#allocation2] sm:$0x1] }
  0xd3   :  { %v77_v31 = vmul.f32 0.125, %v76_v30 }
  0xd5   :  { %78 = vst.msk [vmem:[#allocation6] sm:$0x1] %vm31_vm1, %v77_v31 }
  0xd6   :  { %130 = shalt.err (!%p127_p9)
}
  0xd7   :  { %88 = dma.vmem_to_hbm [thread:$0]  %s86_s19, 16, %s184_s3, [#allocation5]  }
  0xd8   :  { %141 = dma.done.wait [#allocation5], 16  }
  0xd9   :  { %142 = vsyncadd [#allocation5], 4294967280 }
  0xda   :  { %92 = vsyncpa [#allocation4], 1 }
  0xdb   :  { %93 = vsyncpa [#allocation5], 1 }

</bundles_post_ra>
